<compile_context>
chip_gen: v5e
topology: v5e:2x2
jax: 0.10.0
libtpu: 0.0.40
codegen_flags: <defaults>
</compile_context>

<pallas_src>
import jax
import jax.numpy as jnp
import numpy as np
from jax import lax
from jax.experimental import pallas as pl
from jax.experimental.pallas import tpu as pltpu


def tokenizer_kernel(p_ref, w_ref, out_ref):
    """One batch block of: conv(KxK,s=1) -> Identity -> maxpool(3,2,1) -> flatten.

    p_ref:   (Bt*2, Wq, Ho, Fq)   im2col patches; leading dim = (batch, conv-row parity),
                                  Fq = 4 quad-packed conv columns * padded patch (=128).
    w_ref:   (Fq, 4*Cout)         block-diagonal conv weights (one block per quad member).
    out_ref: (Bt, Wq, Ho, 2*Cout) pooled output; lanes = [out col 2q | out col 2q+1].
    """
    Bt2, Wq, Ho, Fq = p_ref.shape
    Bt = Bt2 // 2
    Cout = w_ref.shape[1] // 4
    neg = jnp.finfo(jnp.float32).min

    # ---- Conv2d (bias=False): a single MXU matmul per grid step ----------------
    # rows = (batch, row parity, col quad, pooled row), contraction = Fq, N = 4*Cout.
    lhs = p_ref[...].reshape(Bt2 * Wq * Ho, Fq)
    y = jnp.dot(lhs, w_ref[...], preferred_element_type=jnp.float32)   # (M, 4*Cout)
    y = y.reshape(Bt, 2, Wq, Ho, 4 * Cout)

    # ---- activation: Identity (Tokenizer default activation=None) --------------

    # ---- MaxPool rows (k=3, s=2, p=1): out row i <- conv rows {2i-1, 2i, 2i+1} --
    ev = y[:, 0]                                   # conv rows 2i    (Bt, Wq, Ho, 4*Cout)
    od = y[:, 1]                                   # conv rows 2i+1
    prev = pltpu.roll(od, shift=1, axis=2)         # conv rows 2i-1 (wraps at i == 0)
    ridx = lax.broadcasted_iota(jnp.int32, prev.shape, 2)
    prev = jnp.where(ridx == 0, neg, prev)         # top pad row contributes nothing
    r = jnp.maximum(jnp.maximum(ev, od), prev)     # (Bt, Wq, Ho, 4*Cout)

    # ---- MaxPool cols: lanes of quad q hold conv cols {4q, 4q+1, 4q+2, 4q+3} ---
    c0 = r[..., 0 * Cout:1 * Cout]
    c1 = r[..., 1 * Cout:2 * Cout]
    c2 = r[..., 2 * Cout:3 * Cout]
    c3 = r[..., 3 * Cout:4 * Cout]
    p_odd = jnp.maximum(jnp.maximum(c1, c2), c3)   # out col 2q+1: conv cols {4q+1,4q+2,4q+3}
    p_even = jnp.maximum(c0, c1)                   # out col 2q:   conv cols {4q, 4q+1}
    # missing conv col 4q-1 = c3 of quad q-1: shifted max along the (major) quad axis.
    p_even_rest = jnp.maximum(p_even[:, 1:], c3[:, :-1])
    p_even = jnp.concatenate([p_even[:, :1], p_even_rest], axis=1)

    # ---- lane-dense (2*Cout = 128) output slab: [out col 2q | out col 2q+1] ----
    out = jnp.concatenate([p_even, p_odd], axis=-1)          # (Bt, Wq, Ho, 2*Cout)
    out_ref[...] = out.astype(out_ref.dtype)


def tokenizer_forward(x_nchw, conv_weight, *,
                      kernel_size=3, stride=1, padding=1,
                      pooling_kernel_size=3, pooling_stride=2, pooling_padding=1,
                      batch_block=None):
    """x_nchw: (B, C_in, H, W); conv_weight: (C_out, C_in, K, K). Returns (B, seq, C_out)."""
    B, Cin, H, W = x_nchw.shape
    Cout = conv_weight.shape[0]
    K = kernel_size

    # TODO(synk): conv stride != 1, pooling configs other than (3,2,1), and
    # n_conv_layers > 1 are not implemented (CCT tokenizer defaults are covered).
    assert stride == 1
    assert (pooling_kernel_size, pooling_stride, pooling_padding) == (3, 2, 1)

    Hc = H + 2 * padding - K + 1
    Wc = W + 2 * padding - K + 1
    assert Hc % 2 == 0 and Wc % 4 == 0, "packing assumes even conv rows and Wc % 4 == 0"
    Ho, Wo = Hc // 2, Wc // 2
    Wq = Wc // 4                         # column quads (layout is nicest when Ho % 8 == 0)

    F = K * K * Cin                      # real contraction per conv column (27)
    Fp = max(8, -(-F // 8) * 8)          # zero-padded contraction per column (32)
    Fq = 4 * Fp                          # quad-packed contraction (128 for the defaults)
    No = 4 * Cout

    # ---- layout plumbing in XLA: im2col, quad packing, row-parity-major order ----
    x_nhwc = jnp.transpose(x_nchw, (0, 2, 3, 1))
    x_pad = jnp.pad(x_nhwc, ((0, 0), (padding, padding), (padding, padding), (0, 0)))
    taps = [x_pad[:, ky:ky + Hc, kx:kx + Wc, :] for ky in range(K) for kx in range(K)]
    patches = jnp.concatenate(taps, axis=-1)                        # (B, Hc, Wc, F)
    patches = jnp.pad(patches, ((0, 0), (0, 0), (0, 0), (0, Fp - F)))
    patches = patches.reshape(B, Hc, Wq, Fq)                        # quad-pack conv cols
    patches = patches.reshape(B, Ho, 2, Wq, Fq).transpose(0, 2, 3, 1, 4)
    patches = patches.reshape(B * 2, Wq, Ho, Fq)                    # (batch, row parity) major

    # block-diagonal weights: contraction block s -> conv col 4q+s -> lanes [s*Cout,(s+1)*Cout)
    w_mat = jnp.transpose(conv_weight, (2, 3, 1, 0)).reshape(F, Cout)
    w_blk = jnp.zeros((Fp, Cout), conv_weight.dtype).at[:F, :].set(w_mat)
    w4 = jnp.zeros((Fq, No), conv_weight.dtype)
    for s in range(4):
        w4 = w4.at[s * Fp:(s + 1) * Fp, s * Cout:(s + 1) * Cout].set(w_blk)

    # ---- batch block from a VMEM budget; keep several grid steps when B allows ----
    per_img_bytes = 4 * (2 * (2 * Wq * Ho * Fq)      # double-buffered input block
                         + 3 * (2 * Wq * Ho * No)    # conv f32 intermediate + temporaries
                         + 2 * (Wq * Ho * 2 * Cout))  # double-buffered output block
    budget = 20 * 1024 * 1024                        # fits v7x's 64 MiB/core with headroom
    if batch_block is None:
        bt_cap = max(1, budget // per_img_bytes)
        target_steps = 4 if B >= 4 else max(1, B)    # >=2 steps/core on v7x, DMA overlap
        batch_block = max(1, min(bt_cap, B // target_steps))
        while B % batch_block:
            batch_block -= 1
    Bt = batch_block
    assert B % Bt == 0

    raw = pl.pallas_call(
        tokenizer_kernel,
        out_shape=jax.ShapeDtypeStruct((B, Wq, Ho, 2 * Cout), x_nchw.dtype),
        grid_spec=pltpu.PrefetchScalarGridSpec(
            num_scalar_prefetch=0,
            grid=(B // Bt,),
            in_specs=[
                pl.BlockSpec((Bt * 2, Wq, Ho, Fq), lambda b: (b, 0, 0, 0)),
                # Constant block index: weights stay resident across grid steps.
                pl.BlockSpec((Fq, No), lambda b: (0, 0)),
            ],
            out_specs=pl.BlockSpec((Bt, Wq, Ho, 2 * Cout), lambda b: (b, 0, 0, 0)),
        ),
        compiler_params=pltpu.CompilerParams(
            dimension_semantics=("parallel",),
            vmem_limit_bytes=32 * 1024 * 1024),
    )(patches, w4)

    # (B, Wq, Ho, 2, Cout) -> (B, Ho, Wq, 2, Cout) -> (B, Ho*Wo, Cout): wrapper-side plumbing.
    out = raw.reshape(B, Wq, Ho, 2, Cout).transpose(0, 2, 1, 3, 4)
    return out.reshape(B, Ho * Wo, Cout)


def reference(x_nchw, conv_weight, *, stride=1, padding=1):
    """Pure-JAX reference mirroring the PyTorch Tokenizer forward."""
    y = jax.lax.conv_general_dilated(
        x_nchw, conv_weight,
        window_strides=(stride, stride),
        padding=((padding, padding), (padding, padding)),
        dimension_numbers=("NCHW", "OIHW", "NCHW"),
        precision=jax.lax.Precision.HIGHEST)
    # Identity activation, then MaxPool2d(3, 2, 1).
    y = jax.lax.reduce_window(
        y, -jnp.inf, jax.lax.max,
        window_dimensions=(1, 1, 3, 3),
        window_strides=(1, 1, 2, 2),
        padding=((0, 0), (0, 0), (1, 1), (1, 1)))
    B, C, Ho, Wo = y.shape
    return jnp.transpose(y.reshape(B, C, Ho * Wo), (0, 2, 1))


if __name__ == "__main__":
    # Tokenizer(kernel_size=3, stride=1, padding=1) with module defaults:
    # n_input_channels=3, n_output_channels=64, pooling (3,2,1), conv_bias=False.
    B, Cin, H, W = 2, 3, 16, 16
    Cout, K, STRIDE, PAD = 64, 3, 1, 1

    key = jax.random.PRNGKey(0)
    k_x, k_w = jax.random.split(key)
    x = jax.random.normal(k_x, (B, Cin, H, W), dtype=jnp.float32)
    # Kaiming-normal-ish init (fan_in = Cin*K*K), done host-side like nn.init.
    w = (jax.random.normal(k_w, (Cout, Cin, K, K))
         * np.sqrt(2.0 / (Cin * K * K))).astype(jnp.float32)

    out = tokenizer_forward(x, w, kernel_size=K, stride=STRIDE, padding=PAD)
    out = jax.block_until_ready(out)

    ref = reference(x, w, stride=STRIDE, padding=PAD)
    assert out.shape == (B, (H // 2) * (W // 2), Cout), out.shape
    np.testing.assert_allclose(np.asarray(out), np.asarray(ref), rtol=2e-3, atol=2e-3)

    print("KERNEL_OK")
</pallas_src>

<mosaic_0001>
module attributes {stable_mosaic.version = 11 : i64} {
  func.func @tokenizer_kernel(%arg0: i32, %arg1: memref<2x4x8x128xf32, #tpu.memory_space<vmem>>, %arg2: memref<128x256xf32, #tpu.memory_space<vmem>>, %arg3: memref<1x4x8x128xf32, #tpu.memory_space<vmem>>) attributes {dimension_semantics = [#tpu.dimension_semantics<parallel>], iteration_bounds = array<i64: 2>, scalar_prefetch = 0 : i64, scratch_operands = 0 : i64, tpu.core_type = #tpu.core_type<tc>, window_params = [{transform_indices = @transform_0, window_bounds = array<i64: 2, 4, 8, 128>}, {pipeline_mode = #tpu.pipeline_mode<synchronous>, transform_indices = @transform_1, window_bounds = array<i64: 128, 256>}, {transform_indices = @transform_2, window_bounds = array<i64: 1, 4, 8, 128>}]} {
    %c0 = arith.constant 0 : index
    %c0_0 = arith.constant 0 : index
    %c0_1 = arith.constant 0 : index
    %c0_2 = arith.constant 0 : index
    %0 = vector.load %arg1[%c0, %c0_0, %c0_1, %c0_2] : memref<2x4x8x128xf32, #tpu.memory_space<vmem>>, vector<2x4x8x128xf32>
    %1 = vector.shape_cast %0 : vector<2x4x8x128xf32> to vector<64x128xf32>
    %c0_3 = arith.constant 0 : index
    %c0_4 = arith.constant 0 : index
    %2 = vector.load %arg2[%c0_3, %c0_4] : memref<128x256xf32, #tpu.memory_space<vmem>>, vector<128x256xf32>
    %cst = arith.constant dense<0.000000e+00> : vector<64x256xf32>
    %3 = tpu.matmul %1, %2, %cst {dimension_numbers = #tpu.dot_dimension_numbers<[1], [0], [0], [1], [0, 0, 1, 1], [], []>} : vector<64x128xf32>, vector<128x256xf32>, vector<64x256xf32> -> vector<64x256xf32>
    %4 = vector.shape_cast %3 : vector<64x256xf32> to vector<1x2x4x8x256xf32>
    %5 = vector.extract_strided_slice %4 {offsets = [0, 0, 0, 0, 0], sizes = [1, 1, 4, 8, 256], strides = [1, 1, 1, 1, 1]} : vector<1x2x4x8x256xf32> to vector<1x1x4x8x256xf32>
    %6 = vector.shape_cast %5 : vector<1x1x4x8x256xf32> to vector<1x4x8x256xf32>
    %7 = vector.extract_strided_slice %4 {offsets = [0, 1, 0, 0, 0], sizes = [1, 1, 4, 8, 256], strides = [1, 1, 1, 1, 1]} : vector<1x2x4x8x256xf32> to vector<1x1x4x8x256xf32>
    %8 = vector.shape_cast %7 : vector<1x1x4x8x256xf32> to vector<1x4x8x256xf32>
    %c1_i32 = arith.constant 1 : i32
    %9 = tpu.dynamic_rotate %8 by %c1_i32 dim 2 : vector<1x4x8x256xf32>, i32 -> vector<1x4x8x256xf32>
    %10 = tpu.iota {dimensions = array<i32: 2>} : vector<1x4x8x256xi32>
    %c0_i32 = arith.constant 0 : i32
    %11 = vector.broadcast %c0_i32 : i32 to vector<1x4x8x256xi32>
    %12 = arith.cmpi eq, %10, %11 : vector<1x4x8x256xi32>
    %cst_5 = arith.constant -3.40282347E+38 : f32
    %13 = vector.broadcast %cst_5 : f32 to vector<1x4x8x256xf32>
    %14 = arith.select %12, %13, %9 : vector<1x4x8x256xi1>, vector<1x4x8x256xf32>
    %15 = arith.maximumf %6, %8 : vector<1x4x8x256xf32>
    %16 = arith.maximumf %15, %14 : vector<1x4x8x256xf32>
    %17 = vector.extract_strided_slice %16 {offsets = [0, 0, 0, 0], sizes = [1, 4, 8, 64], strides = [1, 1, 1, 1]} : vector<1x4x8x256xf32> to vector<1x4x8x64xf32>
    %18 = vector.extract_strided_slice %16 {offsets = [0, 0, 0, 64], sizes = [1, 4, 8, 64], strides = [1, 1, 1, 1]} : vector<1x4x8x256xf32> to vector<1x4x8x64xf32>
    %19 = vector.extract_strided_slice %16 {offsets = [0, 0, 0, 128], sizes = [1, 4, 8, 64], strides = [1, 1, 1, 1]} : vector<1x4x8x256xf32> to vector<1x4x8x64xf32>
    %20 = vector.extract_strided_slice %16 {offsets = [0, 0, 0, 192], sizes = [1, 4, 8, 64], strides = [1, 1, 1, 1]} : vector<1x4x8x256xf32> to vector<1x4x8x64xf32>
    %21 = arith.maximumf %18, %19 : vector<1x4x8x64xf32>
    %22 = arith.maximumf %21, %20 : vector<1x4x8x64xf32>
    %23 = arith.maximumf %17, %18 : vector<1x4x8x64xf32>
    %24 = vector.extract_strided_slice %23 {offsets = [0, 1, 0, 0], sizes = [1, 3, 8, 64], strides = [1, 1, 1, 1]} : vector<1x4x8x64xf32> to vector<1x3x8x64xf32>
    %25 = vector.extract_strided_slice %20 {offsets = [0, 0, 0, 0], sizes = [1, 3, 8, 64], strides = [1, 1, 1, 1]} : vector<1x4x8x64xf32> to vector<1x3x8x64xf32>
    %26 = arith.maximumf %24, %25 : vector<1x3x8x64xf32>
    %27 = vector.extract_strided_slice %23 {offsets = [0, 0, 0, 0], sizes = [1, 1, 8, 64], strides = [1, 1, 1, 1]} : vector<1x4x8x64xf32> to vector<1x1x8x64xf32>
    %28 = tpu.concatenate %27, %26 in 1 : vector<1x1x8x64xf32>, vector<1x3x8x64xf32> -> vector<1x4x8x64xf32>
    %29 = tpu.concatenate %28, %22 in 3 : vector<1x4x8x64xf32>, vector<1x4x8x64xf32> -> vector<1x4x8x128xf32>
    %c0_6 = arith.constant 0 : index
    %c0_7 = arith.constant 0 : index
    %c0_8 = arith.constant 0 : index
    %c0_9 = arith.constant 0 : index
    %30 = vector.load %arg3[%c0_6, %c0_7, %c0_8, %c0_9] : memref<1x4x8x128xf32, #tpu.memory_space<vmem>>, vector<1x4x8x128xf32>
    tpu.vector_store %arg3[%c0_6, %c0_7, %c0_8, %c0_9], %29 {strides = array<i32>} : memref<1x4x8x128xf32, #tpu.memory_space<vmem>>, vector<1x4x8x128xf32>,
    return
  }
  func.func @transform_0(%arg0: i32) -> (i32, i32, i32, i32) {
    %c0_i32 = arith.constant 0 : i32
    %c0_i32_0 = arith.constant 0 : i32
    %c0_i32_1 = arith.constant 0 : i32
    %c0_i32_2 = arith.constant 0 : i32
    return %arg0, %c0_i32, %c0_i32_0, %c0_i32_1 : i32, i32, i32, i32
  }
  func.func @transform_1(%arg0: i32) -> (i32, i32) {
    %c0_i32 = arith.constant 0 : i32
    %c0_i32_0 = arith.constant 0 : i32
    %c0_i32_1 = arith.constant 0 : i32
    return %c0_i32, %c0_i32_0 : i32, i32
  }
  func.func @transform_2(%arg0: i32) -> (i32, i32, i32, i32) {
    %c0_i32 = arith.constant 0 : i32
    %c0_i32_0 = arith.constant 0 : i32
    %c0_i32_1 = arith.constant 0 : i32
    %c0_i32_2 = arith.constant 0 : i32
    return %arg0, %c0_i32, %c0_i32_0, %c0_i32_1 : i32, i32, i32, i32
  }
}

</mosaic_0001>

<bundles_post_ra>
// kernel: tpu_custom_call.1
= control target key start
LH: loop header
LB: loop body
LE: loop exit
PB: predicated region body
PF: predicated region fallthrough
CT: control target
= control target key end

     0   :  { %7 = vsyncpa [#allocation3], 0  ;;  %s941_s0 = inlined_call_operand.hbm [shape: f32[4,4,8,128], index: 0, kind: input, shape index: {}]   ;;  %s942_s1 = inlined_call_operand.hbm [shape: f32[128,256], index: 1, kind: input, shape index: {}]   ;;  %s943_s2 = inlined_call_operand.hbm [shape: f32[2,4,8,128], index: 2, kind: output, shape index: {}]  }
   0x1   :  { %9 = vsyncpa [#allocation3 + $0x1], 0 }
   0x2   :  { %10 = vsyncpa [#allocation6], 0 }
   0x3   :  { %11 = vsyncpa [#allocation4], 0 }
   0x4   :  { %13 = vsyncpa [#allocation4 + $0x1], 0  ;;  %s766_s9 = smov 0   ;;  %s768_s10 = smov 0  }
   0x5   :  { %s770_s11 = smov 0   ;;  %s772_s12 = smov 0  }
   0x6 LB: > { %s787_s13 = sadd.s32 4294967295, %s741_s12   ;;  %s495_s14 = sadd.s32 4294967294, %s741_s12   ;;  %s741_s12 = sphi %s772_s12, %s953_s12   ;;  %s737_s11 = sphi %s770_s11, %s952_s11   ;;  %s733_s10 = sphi %s768_s10, %s951_s10   ;;  %s729_s9 = sphi %s766_s9, %s950_s9  }
   0x7   : > { %p39_p0 = scmp.ne.s32.totalorder %s733_s10, %s729_s9  ;;  %p40_p1 = scmp.eq.s32.totalorder %s787_s13, 0 }
   0x8   : > { %p84_p2 = scmp.eq.s32.totalorder %s787_s13, 1  ;;  %p90_p3 = scmp.eq.s32.totalorder %s495_s14, 1 }
   0x9   : > { %p796_p4 = por %p40_p1, %p39_p0  ;;  %p496_p5 = scmp.ge.s32.totalorder %s741_s12, 1 }
   0xa   : > { %p801_p6 = por %p90_p3, %p39_p0  ;;  %p97_p7 = scmp.lt.s32.totalorder %s741_s12, 3 }
   0xb   : > { %s108_s19 = sshll.u32 %s942_s1, 4  ;;  %s743_s21 = smov [#allocation5]   ;;  %s109_s19 = int_to_ptr.hbm [resolvable:$true] %s108_s19 }
   0xc   : > { %p809_p8 = pnand %p496_p5, %p97_p7  ;;  %s110_s22 = sshll.u32 %s743_s21, 4  ;;  %s111_s22 = int_to_ptr.vmem [resolvable:$true] %s110_s22 }
   0xd   : > { %s819_s23 = sadd.s32 1, %s741_s12   ;;  %s744_s24 = smov 256  }
   0xe   : > { %p555_p9 = pneg %p809_p8  ;;  %s745_s25 = smov 16  }
   0xf   : > { %s23_s26 = ssub.s32 %s741_s12, %s819_s23  ;;  %s26_s27 = sadd.s32 1, %s737_s11 }
  0x10   : > { %p556_p10 = pnand %p555_p9, %p40_p1  ;;  %p24_p12 = scmp.eq.s32.totalorder %s23_s26, 0 }
  0x11   : > { %p33_p13 = scmp.ne.s32.totalorder %s737_s11, %s733_s10  ;;  %p34_p0 = scmp.eq.s32.totalorder %s741_s12, 0 }
  0x12   : > { %558 = dma.hbm_to_vmem [thread:$0]  (!%p556_p10), %s109_s19, 4096, %s111_s22, [#allocation6], %s744_s24, %s744_s24, %s745_s25  }
  0x13   : > { %p568_p3 = scmp.lt.s32.totalorder %s741_s12, 2  ;;  %p35_p5 = por %p34_p0, %p33_p13 }
  0x14   : > { %s829_s28 = scalar_select %p24_p12, %s737_s11, %s26_s27  }
  0x15   : > { %p833_p7 = por %p84_p2, %p33_p13  ;;  %s124_s30 = sand.u32 1, %s737_s11  }
  0x16   : > { %s513_s3 = sshll.u32 %s741_s12, 6  ;;  %s499_s4 = sshll.u32 %s124_s30, 6 }
  0x17   : > { %s134_s7 = scalar_lea.hbm %s941_s0, %s513_s3  ;;  %s128_s14 = scalar_lea.vmem [#allocation2], %s499_s4 }
  0x18   : > { %s135_s8 = sshll.u32 %s134_s7, 4  ;;  %s137_s17 = sshll.u32 %s128_s14, 4  ;;  %s136_s8 = int_to_ptr.hbm [resolvable:$true] %s135_s8  ;;  %s138_s17 = int_to_ptr.vmem [resolvable:$true] %s137_s17 }
  0x19   : > { %p844_p9 = pnand %p568_p3, %p35_p5  ;;  %s125_s19 = scalar_lea.sflag [#allocation3], %s124_s30 }
  0x1a   : > { %s641_s21 = sshra.s32 %s136_s8, 4  ;;  %s648_s26 = scalar_lea.hbm %s941_s0, 128  ;;  %s642_s21 = int_to_ptr.hbm [resolvable:$true] %s641_s21 }
  0x1b   : > { %s643_s22 = scalar_lea.hbm %s642_s21, 64  ;;  %p645_p10 = pneg %p844_p9 }
  0x1c   : > { %p644_p2 = scmp.ne.s32.totalorder %s642_s21, %s643_s22  ;;  %p649_p0 = scmp.lt.s32.totalorder %s642_s21, %s941_s0 }
  0x1d   : > { %p650_p3 = scmp.lt.s32.totalorder %s648_s26, %s643_s22 }
  0x1e   : > { %p646_p12 = pnand %p645_p10, %p644_p2 }
  0x1f   : > { %p651_p5 = por %p650_p3, %p649_p0 }
  0x20   : > { %p647_p13 = pneg %p646_p12 }
  0x22   : > { %p652_p11 = pnand %p651_p5, %p647_p13 }
  0x24   : > { %655 = shalt.err (!%p652_p11)
}
  0x25   : > { %s746_s30 = smov 128   ;;  %s747_s4 = smov 8  }
  0x26   : > { %562 = dma.hbm_to_vmem [thread:$0]  (!%p844_p9), %s136_s8, 1024, %s138_s17, %s125_s19, %s746_s30, %s746_s30, %s747_s4  }
  0x27   : > { %149 = sbr.rel (%p809_p8) target bundleno = 370 (0x172), region = 28  ;;  %s861_s5 = sand.u32 (!%p809_p8), 1, %s733_s10  }
  0x28   : > { %s504_s6 = sshll.u32 (!%p809_p8), %s861_s5, 6  ;;  %s152_s7 = scalar_lea.sflag (!%p809_p8), [#allocation3], %s861_s5 }
  0x29   : > { %s865_s14 = scalar_lea.vmem (!%p809_p8), [#allocation2], %s504_s6 }
  0x2c   : > { %716 = dma.done.wait (%p796_p4), %s152_s7, 1024  }
  0x2d   : > { %718 = vsyncadd (%p796_p4), %s152_s7, 4294966272 }
  0x2e   : > { %720 = dma.done.wait (%p40_p1), [#allocation6], 4096  }
  0x2f   : > { %722 = vsyncadd (%p40_p1), [#allocation6], 4294963200  ;;  %v221_v0 = vld [vmem:[#allocation5 + $0xf0] sm:$0xff]  ;;  %v222_v1 = vld [vmem:[#allocation5 + $0xf8] sm:$0xff]  ;;  %v313_v40 = vlaneseq  ;;  %s748_s15 = smov 64   ;;  %s506_s20 = sshll.u32 %s861_s5, 5 }
  0x30   : > { %v219_v2 = vld [vmem:[#allocation5 + $0xe0] sm:$0xff]  ;;  %515 = vmatpush.msra.mxu2 %v221_v0  ;;  %531 = vmatpush.msra.mxu3 %v222_v1  ;;  %v220_v3 = vld [vmem:[#allocation5 + $0xe8] sm:$0xff]  ;;  %v217_v4 = vld [vmem:[#allocation5 + $0xd0] sm:$0xff]  ;;  %vm387_vm1 = vcmask 523264   ;;  %s181_s8 = scalar_lea.vmem [#allocation7], %s506_s20  ;;  %s514_s17 = sshll.u32 %s787_s13, 5 }
  0x31   : > { %v218_v5 = vld [vmem:[#allocation5 + $0xd8] sm:$0xff]  ;;  %264 = vmatpush.msra.mxu1 %v222_v1  ;;  %223 = vmatpush.msra.mxu0 %v221_v0  ;;  %v215_v6 = vld [vmem:[#allocation5 + $0xc0] sm:$0xff]  ;;  %v216_v7 = vld [vmem:[#allocation5 + $0xc8] sm:$0xff]  ;;  %v314_v43 = vshrl.u32 %v313_v40, 7  ;;  %s408_s21 = scalar_lea.hbm %s943_s2, %s514_s17  ;;  %s409_s22 = sshll.u32 %s181_s8, 4  ;;  %s410_s22 = int_to_ptr.vmem [resolvable:$true] %s409_s22 }
  0x32   : > { %516 = vmatpush.msra.mxu2 %v219_v2  ;;  %532 = vmatpush.msra.mxu3 %v220_v3  ;;  %v213_v8 = vld [vmem:[#allocation5 + $0xb0] sm:$0xff]  ;;  %v214_v9 = vld [vmem:[#allocation5 + $0xb8] sm:$0xff]  ;;  %v211_v10 = vld [vmem:[#allocation5 + $0xa0] sm:$0xff]  ;;  %s411_s24 = sshll.u32 %s408_s21, 4  ;;  %s397_s13 = scalar_lea.sflag [#allocation4], %s861_s5  ;;  %s412_s24 = int_to_ptr.hbm [resolvable:$true] %s411_s24 }
  0x33   : > { %265 = vmatpush.msra.mxu1 %v220_v3  ;;  %224 = vmatpush.msra.mxu0 %v219_v2  ;;  %v212_v11 = vld [vmem:[#allocation5 + $0xa8] sm:$0xff]  ;;  %v209_v12 = vld [vmem:[#allocation5 + $0x90] sm:$0xff]  ;;  %v210_v13 = vld [vmem:[#allocation5 + $0x98] sm:$0xff]  ;;  %vm315_vm0 = vcmp.eq.s32.totalorder %v314_v43, 0  ;;  %s685_s25 = sshra.s32 %s412_s24, 4  ;;  %s691_s30 = scalar_lea.hbm %s943_s2, 64  ;;  %s686_s25 = int_to_ptr.hbm [resolvable:$true] %s685_s25 }
  0x34   : > { %517 = vmatpush.msra.mxu2 %v217_v4  ;;  %533 = vmatpush.msra.mxu3 %v218_v5  ;;  %v207_v14 = vld [vmem:[#allocation5 + $0x80] sm:$0xff]  ;;  %v208_v15 = vld [vmem:[#allocation5 + $0x88] sm:$0xff]  ;;  %v205_v16 = vld [vmem:[#allocation5 + $0x70] sm:$0xff]  ;;  %s687_s26 = scalar_lea.hbm %s686_s25, 32  ;;  %p692_p11 = scmp.lt.s32.totalorder %s686_s25, %s943_s2 }
  0x35   : > { %266 = vmatpush.msra.mxu1 %v218_v5  ;;  %225 = vmatpush.msra.mxu0 %v217_v4  ;;  %v206_v17 = vld [vmem:[#allocation5 + $0x78] sm:$0xff]  ;;  %v203_v18 = vld [vmem:[#allocation5 + $0x60] sm:$0xff]  ;;  %v204_v19 = vld [vmem:[#allocation5 + $0x68] sm:$0xff]  ;;  %p688_p1 = scmp.ne.s32.totalorder %s686_s25, %s687_s26  ;;  %p693_p9 = scmp.lt.s32.totalorder %s691_s30, %s687_s26 }
  0x36   : > { %518 = vmatpush.msra.mxu2 %v215_v6  ;;  %534 = vmatpush.msra.mxu3 %v216_v7  ;;  %v201_v20 = vld [vmem:[#allocation5 + $0x50] sm:$0xff]  ;;  %v202_v21 = vld [vmem:[#allocation5 + $0x58] sm:$0xff]  ;;  %v199_v22 = vld [vmem:[#allocation5 + $0x40] sm:$0xff] }
  0x37   : > { %267 = vmatpush.msra.mxu1 %v216_v7  ;;  %226 = vmatpush.msra.mxu0 %v215_v6  ;;  %v200_v23 = vld [vmem:[#allocation5 + $0x48] sm:$0xff]  ;;  %v197_v24 = vld [vmem:[#allocation5 + $0x30] sm:$0xff]  ;;  %v198_v25 = vld [vmem:[#allocation5 + $0x38] sm:$0xff]  ;;  %p689_p4 = pnand %p688_p1, %p833_p7  ;;  %p694_p2 = por %p693_p9, %p692_p11 }
  0x38   : > { %519 = vmatpush.msra.mxu2 %v213_v8  ;;  %535 = vmatpush.msra.mxu3 %v214_v9  ;;  %v195_v26 = vld [vmem:[#allocation5 + $0x20] sm:$0xff]  ;;  %v196_v27 = vld [vmem:[#allocation5 + $0x28] sm:$0xff]  ;;  %v193_v28 = vld [vmem:[#allocation5 + $0x10] sm:$0xff] }
  0x39   : > { %268 = vmatpush.msra.mxu1 %v214_v9  ;;  %227 = vmatpush.msra.mxu0 %v213_v8  ;;  %v194_v29 = vld [vmem:[#allocation5 + $0x18] sm:$0xff]  ;;  %v191_v30 = vld [vmem:[#allocation5] sm:$0xff]  ;;  %v192_v31 = vld [vmem:[#allocation5 + $0x8] sm:$0xff]  ;;  %p690_p8 = pneg %p689_p4 }
  0x3a   : > { %520 = vmatpush.msra.mxu2 %v211_v10  ;;  %536 = vmatpush.msra.mxu3 %v212_v11  ;;  %v187_v32 = vld [vmem:[%s865_s14 + $0x20] sm:$0xff]  ;;  %v188_v34 = vld [vmem:[%s865_s14 + $0x28] sm:$0xff]  ;;  %v189_v36 = vld [vmem:[%s865_s14 + $0x30] sm:$0xff] }
  0x3b   : > { %269 = vmatpush.msra.mxu1 %v212_v11  ;;  %228 = vmatpush.msra.mxu0 %v211_v10  ;;  %v183_v33 = vld [vmem:[%s865_s14] sm:$0xff]  ;;  %v184_v35 = vld [vmem:[%s865_s14 + $0x8] sm:$0xff]  ;;  %v185_v37 = vld [vmem:[%s865_s14 + $0x10] sm:$0xff]  ;;  %p695_p10 = pnand %p694_p2, %p690_p8 }
  0x3c   : > { %521 = vmatpush.msra.mxu2 %v209_v12  ;;  %537 = vmatpush.msra.mxu3 %v210_v13  ;;  %v190_v38 = vld [vmem:[%s865_s14 + $0x38] sm:$0xff] }
  0x3d   : > { %270 = vmatpush.msra.mxu1 %v210_v13  ;;  %229 = vmatpush.msra.mxu0 %v209_v12  ;;  %v186_v39 = vld [vmem:[%s865_s14 + $0x18] sm:$0xff] }
  0x3e   : > { %522 = vmatpush.msra.mxu2 %v207_v14  ;;  %538 = vmatpush.msra.mxu3 %v208_v15 }
  0x3f   : > { %271 = vmatpush.msra.mxu1 %v208_v15  ;;  %230 = vmatpush.msra.mxu0 %v207_v14 }
  0x40   : > { %523 = vmatpush.msra.mxu2 %v205_v16  ;;  %539 = vmatpush.msra.mxu3 %v206_v17 }
  0x41   : > { %272 = vmatpush.msra.mxu1 %v206_v17  ;;  %231 = vmatpush.msra.mxu0 %v205_v16 }
  0x42   : > { %524 = vmatpush.msra.mxu2 %v203_v18  ;;  %540 = vmatpush.msra.mxu3 %v204_v19 }
  0x43   : > { %273 = vmatpush.msra.mxu1 %v204_v19  ;;  %232 = vmatpush.msra.mxu0 %v203_v18 }
  0x44   : > { %525 = vmatpush.msra.mxu2 %v201_v20  ;;  %541 = vmatpush.msra.mxu3 %v202_v21 }
  0x45   : > { %274 = vmatpush.msra.mxu1 %v202_v21  ;;  %233 = vmatpush.msra.mxu0 %v201_v20 }
  0x46   : > { %526 = vmatpush.msra.mxu2 %v199_v22  ;;  %542 = vmatpush.msra.mxu3 %v200_v23 }
  0x47   : > { %275 = vmatpush.msra.mxu1 %v200_v23  ;;  %234 = vmatpush.msra.mxu0 %v199_v22 }
  0x48   : > { %527 = vmatpush.msra.mxu2 %v197_v24  ;;  %543 = vmatpush.msra.mxu3 %v198_v25 }
  0x49   : > { %276 = vmatpush.msra.mxu1 %v198_v25  ;;  %235 = vmatpush.msra.mxu0 %v197_v24 }
  0x4a   : > { %528 = vmatpush.msra.mxu2 %v195_v26  ;;  %544 = vmatpush.msra.mxu3 %v196_v27 }
  0x4b   : > { %277 = vmatpush.msra.mxu1 %v196_v27  ;;  %236 = vmatpush.msra.mxu0 %v195_v26 }
  0x4c   : > { %529 = vmatpush.msra.mxu2 %v193_v28  ;;  %545 = vmatpush.msra.mxu3 %v194_v29 }
  0x4d   : > { %278 = vmatpush.msra.mxu1 %v194_v29  ;;  %237 = vmatpush.msra.mxu0 %v193_v28 }
  0x4e   : > { %530 = vmatpush.msra.mxu2 %v191_v30  ;;  %546 = vmatpush.msra.mxu3 %v192_v31 }
  0x4f   : > { %251 = vmatmul.f32.vlgmr.msra.gmra.mxu2 %v187_v32  ;;  %292 = vmatmul.f32.vlgmr.msra.gmra.mxu3 %v187_v32 }
  0x50   : > { %279 = vmatpush.msra.mxu1 %v192_v31  ;;  %238 = vmatpush.msra.mxu0 %v191_v30 }
  0x51   : > { %280 = vmatmul.f32.vlgmr.msra.gmra.mxu1 %v183_v33  ;;  %239 = vmatmul.f32.vlgmr.msra.gmra.mxu0 %v183_v33 }
  0x57   : > { %254 = vmatmul.f32.gmra.mxu2 %v188_v34  ;;  %295 = vmatmul.f32.gmra.mxu3 %v188_v34 }
  0x59   : > { %283 = vmatmul.f32.gmra.mxu1 %v184_v35  ;;  %242 = vmatmul.f32.gmra.mxu0 %v184_v35 }
  0x5f   : > { %257 = vmatmul.f32.gmra.mxu2 %v189_v36  ;;  %298 = vmatmul.f32.gmra.mxu3 %v189_v36 }
  0x61   : > { %286 = vmatmul.f32.gmra.mxu1 %v185_v37  ;;  %245 = vmatmul.f32.gmra.mxu0 %v185_v37 }
  0x67   : > { %260 = vmatmul.f32.gmra.mxu2 %v190_v38  ;;  %301 = vmatmul.f32.gmra.mxu3 %v190_v38 }
  0x69   : > { %289 = vmatmul.f32.gmra.mxu1 %v186_v39  ;;  %248 = vmatmul.f32.gmra.mxu0 %v186_v39 }
  0xce   : > { %v281_v41 = vpop.f32.mrf.mxu1  ;;  %v240_v42 = vpop.f32.mrf.mxu0 }
  0xd2   : > { %v252_v44 = vpop.f32.mrf.mxu2  ;;  %v293_v45 = vpop.f32.mrf.mxu3 }
  0xd3   : > { %v306_v46 = vrot.slane %v293_v45, 7  ;;  %v325_v47 = vmax.f32 %v281_v41, %v293_v45  ;;  %v305_v22 = vrot.slane %v252_v44, 7  ;;  %v324_v23 = vmax.f32 %v240_v42, %v252_v44 }
  0xd5   : > { %v317_v48 = vsel %vm315_vm0, -3.4028235e+38, %v306_v46  ;;  %v316_v24 = vsel %vm315_vm0, -3.4028235e+38, %v305_v22 }
  0xd6   : > { %v884_v49 = vmax.f32 %v325_v47, %v317_v48  ;;  %v284_v50 = vpop.f32.mrf.mxu1  ;;  %v243_v51 = vpop.f32.mrf.mxu0  ;;  %v332_v25 = vmax.f32 %v324_v23, %v316_v24 }
  0xd8   : > { %344 = vrot.lane.b32.xlu0 %v884_v49, %s748_s15 }
  0xda   : > { %v255_v52 = vpop.f32.mrf.mxu2  ;;  %v296_v53 = vpop.f32.mrf.mxu3 }
  0xdb   : > { %v307_v54 = vrot.slane %v255_v52, 7  ;;  %v308_v55 = vrot.slane %v296_v53, 7  ;;  %v327_v56 = vmax.f32 %v284_v50, %v296_v53  ;;  %v326_v57 = vmax.f32 %v243_v51, %v255_v52 }
  0xdd   : > { %v319_v58 = vsel %vm315_vm0, -3.4028235e+38, %v308_v55  ;;  %v318_v59 = vsel %vm315_vm0, -3.4028235e+38, %v307_v54 }
  0xde   : > { %v335_v60 = vmax.f32 %v327_v56, %v319_v58  ;;  %v334_v61 = vmax.f32 %v326_v57, %v318_v59  ;;  %v287_v62 = vpop.f32.mrf.mxu1  ;;  %v246_v63 = vpop.f32.mrf.mxu0 }
  0xe0   : > { %346 = vrot.lane.b32.xlu0 %v335_v60, %s748_s15  ;;  %370 = vrot.lane.b32.xlu2 %v334_v61, %s748_s15 }
  0xe2   : > { %v258_v0 = vpop.f32.mrf.mxu2  ;;  %v299_v1 = vpop.f32.mrf.mxu3 }
  0xe3   : > { %v309_v2 = vrot.slane %v258_v0, 7  ;;  %v310_v3 = vrot.slane %v299_v1, 7  ;;  %v329_v4 = vmax.f32 %v287_v62, %v299_v1  ;;  %v328_v5 = vmax.f32 %v246_v63, %v258_v0 }
  0xe5   : > { %v320_v6 = vsel %vm315_vm0, -3.4028235e+38, %v309_v2  ;;  %v321_v7 = vsel %vm315_vm0, -3.4028235e+38, %v310_v3 }
  0xe6   : > { %v336_v8 = vmax.f32 %v328_v5, %v320_v6  ;;  %v337_v9 = vmax.f32 %v329_v4, %v321_v7  ;;  %v290_v10 = vpop.f32.mrf.mxu1  ;;  %v249_v11 = vpop.f32.mrf.mxu0 }
  0xe8   : > { %348 = vrot.lane.b32.xlu1 %v337_v9, %s748_s15  ;;  %372 = vrot.lane.b32.xlu2 %v336_v8, %s748_s15 }
  0xea   : > { %v261_v12 = vpop.f32.mrf.mxu2  ;;  %v302_v13 = vpop.f32.mrf.mxu3 }
  0xeb   : > { %v311_v14 = vrot.slane %v261_v12, 7  ;;  %v312_v15 = vrot.slane %v302_v13, 7  ;;  %v331_v16 = vmax.f32 %v290_v10, %v302_v13  ;;  %v330_v17 = vmax.f32 %v249_v11, %v261_v12 }
  0xed   : > { %v322_v18 = vsel %vm315_vm0, -3.4028235e+38, %v311_v14  ;;  %v323_v19 = vsel %vm315_vm0, -3.4028235e+38, %v312_v15 }
  0xee   : > { %v339_v20 = vmax.f32 %v331_v16, %v323_v19  ;;  %v338_v21 = vmax.f32 %v330_v17, %v322_v18 }
  0xf0   : > { %350 = vrot.lane.b32.xlu1 %v339_v20, %s748_s15  ;;  %374 = vrot.lane.b32.xlu0 %v338_v21, %s748_s15 }
  0xf8   : > { %368 = vrot.lane.b32.xlu1 %v332_v25, %s748_s15 }
 0x13a   : > { %v371_v27 = vpop.permute.xlu2 %370 }
 0x13b   : > { %v381_v29 = vmax.f32 %v334_v61, %v371_v27 }
 0x142   : > { %v373_v34 = vpop.permute.xlu2 %372 }
 0x143   : > { %v382_v36 = vmax.f32 %v336_v8, %v373_v34 }
 0x14a   : > { %v345_v26 = vpop.permute.xlu0 %344 }
 0x14b   : > { %v384_v31 = vmax.f32 %v381_v29, %v345_v26  ;;  %v356_v47 = vmax.f32 %v332_v25, %v345_v26 }
 0x14d   : > { %v360_v51 = vmax.f32 %v356_v47, %v884_v49 }
 0x152   : > { %v347_v28 = vpop.permute.xlu0 %346 }
 0x153   : > { %v357_v30 = vmax.f32 %v334_v61, %v347_v28  ;;  %v385_v38 = vmax.f32 %v382_v36, %v347_v28 }
 0x155   : > { %v361_v32 = vmax.f32 %v357_v30, %v335_v60 }
 0x157   : > { %v389_v33 = vsel %vm387_vm1, %v384_v31, %v361_v32 }
 0x158   : > { %393 = vst [vmem:[%s181_s8 + $0x8] sm:$0xff] %v389_v33 }
 0x15a   : > { %v349_v35 = vpop.permute.xlu1 %348 }
 0x15b   : > { %v358_v37 = vmax.f32 %v336_v8, %v349_v35 }
 0x15d   : > { %v362_v39 = vmax.f32 %v358_v37, %v337_v9 }
 0x15f   : > { %v390_v40 = vsel %vm387_vm1, %v385_v38, %v362_v39 }
 0x160   : > { %394 = vst [vmem:[%s181_s8 + $0x10] sm:$0xff] %v390_v40 }
 0x162   : > { %v351_v41 = vpop.permute.xlu1 %350  ;;  %v375_v42 = vpop.permute.xlu0 %374 }
 0x163   : > { %v359_v43 = vmax.f32 %v338_v21, %v351_v41  ;;  %v383_v44 = vmax.f32 %v338_v21, %v375_v42 }
 0x165   : > { %v363_v45 = vmax.f32 %v359_v43, %v339_v20  ;;  %v386_v46 = vmax.f32 %v383_v44, %v349_v35 }
 0x167   : > { %v391_v48 = vsel %vm387_vm1, %v386_v46, %v363_v45 }
 0x168   : > { %395 = vst [vmem:[%s181_s8 + $0x18] sm:$0xff] %v391_v48 }
 0x16a   : > { %v369_v50 = vpop.permute.xlu1 %368 }
 0x16b   : > { %v380_v52 = vmax.f32 %v332_v25, %v369_v50 }
 0x16d   : > { %v388_v53 = vsel %vm387_vm1, %v380_v52, %v360_v51 }
 0x16e   : > { %392 = vst [vmem:[%s181_s8] sm:$0xff] %v388_v53 }
 0x16f   : > { %698 = shalt.err (!%p695_p10)
}
 0x170   : > { %s749_s5 = smov 128   ;;  %s750_s7 = smov 8  }
 0x171   : > { %553 = dma.vmem_to_hbm [thread:$0]  (%p833_p7), %s410_s22, 512, %s412_s24, %s397_s13, %s749_s5, %s749_s5, %s750_s7  }
 0x172 PF: > { %s426_s14 = sand.u32 1, %s729_s9   ;;  %p949_p12 = scmp.ge.s32.totalorder %s741_s12, 2 }
 0x173   : > { %s427_s15 = scalar_lea.sflag [#allocation4], %s426_s14 }
 0x174   : > { %p564_p13 = pnand %p949_p12, %p801_p6 }
 0x176   : > { %p565_p0 = pneg %p564_p13 }
 0x178   : > { %724 = dma.done.wait (%p565_p0), %s427_s15, 512  }
 0x179   : > { %726 = vsyncadd (%p565_p0), %s427_s15, 4294966784  ;;  %p16_p3 = scmp.ge.s32.totalorder %s819_s23, 4   ;;  %s950_s9 = smov %s733_s10 }
 0x17a   : > { %s951_s10 = smov %s737_s11  ;;  %s952_s11 = smov %s829_s28 }
 0x17b   : > { %s953_s12 = smov %s819_s23  ;;  %18 = sbr.rel (!%p16_p3) target bundleno = 6 (0x6), region = 77 }
 0x180   :  { %433 = vsyncpa [#allocation3], 1 }
 0x181   :  { %435 = vsyncpa [#allocation3 + $0x1], 1 }
 0x182   :  { %436 = vsyncpa [#allocation6], 1 }
 0x183   :  { %437 = vsyncpa [#allocation4], 1 }
 0x184   :  { %439 = vsyncpa [#allocation4 + $0x1], 1 }

</bundles_post_ra>
